<compile_context>
chip_gen: v7x
topology: tpu7x:2x2x1
jax: 0.10.0
libtpu: 0.0.40
codegen_flags: <defaults>
</compile_context>

<pallas_src>
import functools

import jax
import jax.numpy as jnp
from jax.experimental import pallas as pl
from jax.experimental.pallas import tpu as pltpu

LANE = 128


def _round_up(a, b):
    return (a + b - 1) // b * b


def _focal_loss_kernel(pred_ref, true_ref, acc_ref, *, gamma, alpha, total, tile_rows):
    """Processes one lane-dense (tile_rows, 128) slab of the flattened inputs."""
    i = pl.program_id(0)

    @pl.when(i == 0)
    def _():
        acc_ref[...] = jnp.zeros_like(acc_ref)

    x = pred_ref[...].astype(jnp.float32)   # logits
    t = true_ref[...].astype(jnp.float32)   # targets

    # BCE-with-logits, reduction='none', numerically stable:
    #   bce = max(x,0) - x*t + log1p(exp(-|x|))
    # exp(-|x|) is reused for sigmoid(x), so one exp + one log per element.
    e = jnp.exp(-jnp.abs(x))                          # in (0, 1]
    bce = jnp.maximum(x, 0.0) - x * t + jnp.log1p(e)

    inv = 1.0 / (1.0 + e)
    p = jnp.where(x >= 0.0, inv, e * inv)             # sigmoid(x)

    p_t = t * p + (1.0 - t) * (1.0 - p)
    alpha_factor = t * alpha + (1.0 - t) * (1.0 - alpha)
    omp = 1.0 - p_t                                   # in [0, 1]

    if gamma == 1.5:
        mod = omp * jnp.sqrt(omp)
    elif gamma == 2.0:
        mod = omp * omp
    elif gamma == 1.0:
        mod = omp
    else:
        mod = jnp.where(omp > 0.0,
                        jnp.exp(gamma * jnp.log(jnp.maximum(omp, 1e-38))),
                        0.0)

    loss = bce * (alpha_factor * mod)

    # Mask padded tail elements (global flat index >= total).
    rows = jax.lax.broadcasted_iota(jnp.int32, loss.shape, 0)
    lanes = jax.lax.broadcasted_iota(jnp.int32, loss.shape, 1)
    flat_idx = (i * tile_rows + rows) * LANE + lanes
    loss = jnp.where(flat_idx < total, loss, 0.0)

    # Per-lane partial sums (sublane reduce only); cross-lane sum happens outside.
    acc_ref[...] += jnp.sum(loss, axis=0, keepdims=True)


def focal_loss(pred, true, gamma=1.5, alpha=0.25, reduction="mean",
               max_tile_rows=2048):
    """Pallas TPU forward of FocalLoss(nn.BCEWithLogitsLoss(), gamma, alpha)."""
    assert pred.shape == true.shape
    assert reduction in ("mean", "sum"), (
        # TODO(synk): reduction='none' (full elementwise output) not implemented here.
        "only 'mean'/'sum' reductions supported")

    total = int(pred.size)
    rows_needed = pl.cdiv(total, LANE)
    tile_rows = min(int(max_tile_rows), _round_up(rows_needed, 8))
    tile_rows = max(8, _round_up(tile_rows, 8))
    num_tiles = pl.cdiv(rows_needed, tile_rows)
    padded_rows = num_tiles * tile_rows
    pad = padded_rows * LANE - total

    pflat = jnp.ravel(pred)
    tflat = jnp.ravel(true)
    if pad:
        pflat = jnp.pad(pflat, (0, pad))
        tflat = jnp.pad(tflat, (0, pad))
    pred2d = pflat.reshape(padded_rows, LANE)
    true2d = tflat.reshape(padded_rows, LANE)

    kernel = functools.partial(
        _focal_loss_kernel,
        gamma=float(gamma), alpha=float(alpha),
        total=total, tile_rows=int(tile_rows))

    bytes_in = total * (pred.dtype.itemsize + true.dtype.itemsize)
    acc = pl.pallas_call(
        kernel,
        out_shape=jax.ShapeDtypeStruct((1, LANE), jnp.float32),
        grid_spec=pltpu.PrefetchScalarGridSpec(
            num_scalar_prefetch=0,
            grid=(num_tiles,),
            in_specs=[
                pl.BlockSpec((tile_rows, LANE), lambda i: (i, 0)),
                pl.BlockSpec((tile_rows, LANE), lambda i: (i, 0)),
            ],
            out_specs=pl.BlockSpec((1, LANE), lambda i: (0, 0)),
        ),
        compiler_params=pltpu.CompilerParams(
            dimension_semantics=("arbitrary",)),
        cost_estimate=pl.CostEstimate(
            flops=25 * total,
            transcendentals=3 * total,
            bytes_accessed=bytes_in + 4 * LANE),
    )(pred2d, true2d)

    s = jnp.sum(acc)
    if reduction == "mean":
        return s / total
    return s


def _reference(pred, true, gamma=1.5, alpha=0.25):
    # Pure-JAX mirror of the PyTorch FocalLoss forward (BCEWithLogitsLoss, mean).
    x = pred.astype(jnp.float32)
    t = true.astype(jnp.float32)
    bce = jnp.maximum(x, 0.0) - x * t + jnp.log1p(jnp.exp(-jnp.abs(x)))
    p = jax.nn.sigmoid(x)
    p_t = t * p + (1.0 - t) * (1.0 - p)
    alpha_factor = t * alpha + (1.0 - t) * (1.0 - alpha)
    modulating_factor = (1.0 - p_t) ** gamma
    return jnp.mean(bce * alpha_factor * modulating_factor)


if __name__ == "__main__":
    key = jax.random.PRNGKey(0)
    k1, k2, k3, k4 = jax.random.split(key, 4)

    # Small example consistent with the module: [N, C] logits + binary targets.
    N, C = 16, 8
    pred = jax.random.normal(k1, (N, C), dtype=jnp.float32)
    true = (jax.random.uniform(k2, (N, C)) > 0.5).astype(jnp.float32)

    out = jax.block_until_ready(focal_loss(pred, true, gamma=1.5, alpha=0.25))
    ref = _reference(pred, true, gamma=1.5, alpha=0.25)
    assert jnp.allclose(out, ref, atol=1e-6, rtol=1e-5), (out, ref)

    # Multi-tile + ragged-tail + bf16-DMA path (forces 2 grid steps with tiny tiles).
    pred2 = jax.random.normal(k3, (130, 9), dtype=jnp.bfloat16)
    true2 = (jax.random.uniform(k4, (130, 9)) > 0.5).astype(jnp.bfloat16)
    out2 = jax.block_until_ready(focal_loss(pred2, true2, max_tile_rows=8))
    ref2 = _reference(pred2, true2)
    assert jnp.allclose(out2, ref2, atol=1e-6, rtol=1e-5), (out2, ref2)

    print("KERNEL_OK")
</pallas_src>

<mosaic_0001>
module attributes {stable_mosaic.version = 11 : i64} {
  func.func @_focal_loss_kernel(%arg0: i32, %arg1: memref<8x128xf32, #tpu.memory_space<vmem>>, %arg2: memref<8x128xf32, #tpu.memory_space<vmem>>, %arg3: memref<1x128xf32, #tpu.memory_space<vmem>>) attributes {dimension_semantics = [#tpu.dimension_semantics<arbitrary>], iteration_bounds = array<i64: 1>, scalar_prefetch = 0 : i64, scratch_operands = 0 : i64, tpu.core_type = #tpu.core_type<tc>, window_params = [{transform_indices = @transform_0, window_bounds = array<i64: 8, 128>}, {transform_indices = @transform_1, window_bounds = array<i64: 8, 128>}, {pipeline_mode = #tpu.pipeline_mode<synchronous>, transform_indices = @transform_2, window_bounds = array<i64: 1, 128>}]} {
    %c0_i32 = arith.constant 0 : i32
    %0 = arith.cmpi eq, %arg0, %c0_i32 : i32
    %1 = arith.extui %0 : i1 to i32
    %c0_i32_0 = arith.constant 0 : i32
    %2 = arith.cmpi ne, %1, %c0_i32_0 : i32
    scf.if %2 {
      %cst_21 = arith.constant 0.000000e+00 : f32
      %60 = vector.broadcast %cst_21 : f32 to vector<1x128xf32>
      %c0_22 = arith.constant 0 : index
      %c0_23 = arith.constant 0 : index
      %61 = vector.load %arg3[%c0_22, %c0_23] : memref<1x128xf32, #tpu.memory_space<vmem>>, vector<1x128xf32>
      tpu.vector_store %arg3[%c0_22, %c0_23], %60 {strides = array<i32>} : memref<1x128xf32, #tpu.memory_space<vmem>>, vector<1x128xf32>,
    } else {
    }
    %c0 = arith.constant 0 : index
    %c0_1 = arith.constant 0 : index
    %3 = vector.load %arg1[%c0, %c0_1] : memref<8x128xf32, #tpu.memory_space<vmem>>, vector<8x128xf32>
    %c0_2 = arith.constant 0 : index
    %c0_3 = arith.constant 0 : index
    %4 = vector.load %arg2[%c0_2, %c0_3] : memref<8x128xf32, #tpu.memory_space<vmem>>, vector<8x128xf32>
    %5 = math.absf %3 : vector<8x128xf32>
    %cst = arith.constant 0.000000e+00 : f32
    %6 = vector.broadcast %cst : f32 to vector<8x128xf32>
    %7 = arith.subf %6, %5 : vector<8x128xf32>
    %8 = math.exp %7 : vector<8x128xf32>
    %cst_4 = arith.constant 0.000000e+00 : f32
    %9 = vector.broadcast %cst_4 : f32 to vector<8x128xf32>
    %10 = arith.maximumf %3, %9 : vector<8x128xf32>
    %11 = arith.mulf %3, %4 : vector<8x128xf32>
    %12 = arith.subf %10, %11 : vector<8x128xf32>
    %13 = math.log1p %8 : vector<8x128xf32>
    %14 = arith.addf %12, %13 : vector<8x128xf32>
    %cst_5 = arith.constant 1.000000e+00 : f32
    %15 = vector.broadcast %cst_5 : f32 to vector<8x128xf32>
    %16 = arith.addf %15, %8 : vector<8x128xf32>
    %cst_6 = arith.constant 1.000000e+00 : f32
    %17 = vector.broadcast %cst_6 : f32 to vector<8x128xf32>
    %18 = arith.divf %17, %16 : vector<8x128xf32>
    %cst_7 = arith.constant 0.000000e+00 : f32
    %19 = vector.broadcast %cst_7 : f32 to vector<8x128xf32>
    %20 = arith.cmpf oge, %3, %19 : vector<8x128xf32>
    %21 = arith.mulf %8, %18 : vector<8x128xf32>
    %22 = arith.select %20, %18, %21 : vector<8x128xi1>, vector<8x128xf32>
    %23 = arith.mulf %4, %22 : vector<8x128xf32>
    %cst_8 = arith.constant 1.000000e+00 : f32
    %24 = vector.broadcast %cst_8 : f32 to vector<8x128xf32>
    %25 = arith.subf %24, %4 : vector<8x128xf32>
    %cst_9 = arith.constant 1.000000e+00 : f32
    %26 = vector.broadcast %cst_9 : f32 to vector<8x128xf32>
    %27 = arith.subf %26, %22 : vector<8x128xf32>
    %28 = arith.mulf %25, %27 : vector<8x128xf32>
    %29 = arith.addf %23, %28 : vector<8x128xf32>
    %cst_10 = arith.constant 2.500000e-01 : f32
    %30 = vector.broadcast %cst_10 : f32 to vector<8x128xf32>
    %31 = arith.mulf %4, %30 : vector<8x128xf32>
    %cst_11 = arith.constant 1.000000e+00 : f32
    %32 = vector.broadcast %cst_11 : f32 to vector<8x128xf32>
    %33 = arith.subf %32, %4 : vector<8x128xf32>
    %cst_12 = arith.constant 7.500000e-01 : f32
    %34 = vector.broadcast %cst_12 : f32 to vector<8x128xf32>
    %35 = arith.mulf %33, %34 : vector<8x128xf32>
    %36 = arith.addf %31, %35 : vector<8x128xf32>
    %cst_13 = arith.constant 1.000000e+00 : f32
    %37 = vector.broadcast %cst_13 : f32 to vector<8x128xf32>
    %38 = arith.subf %37, %29 : vector<8x128xf32>
    %39 = math.sqrt %38 : vector<8x128xf32>
    %40 = arith.mulf %38, %39 : vector<8x128xf32>
    %41 = arith.mulf %36, %40 : vector<8x128xf32>
    %42 = arith.mulf %14, %41 : vector<8x128xf32>
    %43 = tpu.iota {dimensions = array<i32: 0>} : vector<8x128xi32>
    %44 = tpu.iota {dimensions = array<i32: 1>} : vector<8x128xi32>
    %c8_i32 = arith.constant 8 : i32
    %45 = arith.muli %arg0, %c8_i32 : i32
    %46 = vector.broadcast %45 : i32 to vector<8x128xi32>
    %47 = arith.addi %46, %43 : vector<8x128xi32>
    %c128_i32 = arith.constant 128 : i32
    %48 = vector.broadcast %c128_i32 : i32 to vector<8x128xi32>
    %49 = arith.muli %47, %48 : vector<8x128xi32>
    %50 = arith.addi %49, %44 : vector<8x128xi32>
    %c128_i32_14 = arith.constant 128 : i32
    %51 = vector.broadcast %c128_i32_14 : i32 to vector<8x128xi32>
    %52 = arith.cmpi slt, %50, %51 : vector<8x128xi32>
    %cst_15 = arith.constant 0.000000e+00 : f32
    %53 = vector.broadcast %cst_15 : f32 to vector<8x128xf32>
    %54 = arith.select %52, %42, %53 : vector<8x128xi1>, vector<8x128xf32>
    %c0_16 = arith.constant 0 : index
    %c0_17 = arith.constant 0 : index
    %55 = vector.load %arg3[%c0_16, %c0_17] : memref<1x128xf32, #tpu.memory_space<vmem>>, vector<1x128xf32>
    %cst_18 = arith.constant dense<0.000000e+00> : vector<128xf32>
    %56 = vector.multi_reduction <add>, %54, %cst_18 [0] : vector<8x128xf32> to vector<128xf32>
    %57 = vector.shape_cast %56 : vector<128xf32> to vector<1x128xf32>
    %58 = arith.addf %55, %57 : vector<1x128xf32>
    %c0_19 = arith.constant 0 : index
    %c0_20 = arith.constant 0 : index
    %59 = vector.load %arg3[%c0_19, %c0_20] : memref<1x128xf32, #tpu.memory_space<vmem>>, vector<1x128xf32>
    tpu.vector_store %arg3[%c0_19, %c0_20], %58 {strides = array<i32>} : memref<1x128xf32, #tpu.memory_space<vmem>>, vector<1x128xf32>,
    return
  }
  func.func @transform_0(%arg0: i32) -> (i32, i32) {
    %c0_i32 = arith.constant 0 : i32
    %c0_i32_0 = arith.constant 0 : i32
    return %arg0, %c0_i32 : i32, i32
  }
  func.func @transform_1(%arg0: i32) -> (i32, i32) {
    %c0_i32 = arith.constant 0 : i32
    %c0_i32_0 = arith.constant 0 : i32
    return %arg0, %c0_i32 : i32, i32
  }
  func.func @transform_2(%arg0: i32) -> (i32, i32) {
    %c0_i32 = arith.constant 0 : i32
    %c0_i32_0 = arith.constant 0 : i32
    %c0_i32_1 = arith.constant 0 : i32
    return %c0_i32, %c0_i32_0 : i32, i32
  }
}

</mosaic_0001>

<bundles_post_ra>
// kernel: tpu_custom_call.1
= control target key start
LH: loop header
LB: loop body
LE: loop exit
PB: predicated region body
PF: predicated region fallthrough
CT: control target
= control target key end

     0   :  { %7 = vsyncpa [#allocation3], 0  ;;  %s266_s0 = inlined_call_operand.hbm [shape: f32[8,128], index: 0, kind: input, shape index: {}]   ;;  %s267_s1 = inlined_call_operand.hbm [shape: f32[8,128], index: 1, kind: input, shape index: {}]   ;;  %s268_s2 = inlined_call_operand.hbm [shape: f32[1,128], index: 2, kind: output, shape index: {}]  }
   0x1   :  { %8 = vsyncpa [#allocation6], 0 }
   0x2   :  { %9 = vsyncpa [#allocation4], 0  ;;  %s205_s9 = smov [#allocation2]   ;;  %s206_s11 = smov [#allocation5]  }
   0x3   :  { %s16_s10 = sshll.u32 %s205_s9, 4  ;;  %s26_s12 = sshll.u32 %s206_s11, 4  ;;  %s17_s10 = int_to_ptr.vmem [resolvable:$true] %s16_s10  ;;  %s27_s12 = int_to_ptr.vmem [resolvable:$true] %s26_s12 }
   0x4   :  { %s133_s15 = scalar_lea.hbm %s266_s0, 128 }
   0x5   :  { %p134_p0 = scmp.ne.s32.totalorder %s266_s0, %s133_s15  ;;  %p137_p1 = scmp.lt.u32.totalorder %s133_s15, %s266_s0 }
   0x7   :  { %p139_p2 = pnand %p137_p1, %p134_p0 }
   0x9   :  { %142 = shalt.err (!%p139_p2)
}
   0xa   :  { %s143_s20 = scalar_lea.vmem %s17_s10, 128  ;;  %p148_p4 = scmp.lt.s32.totalorder %s17_s10, %s17_s10 }
   0xb   :  { %p144_p3 = scmp.ne.s32.totalorder %s17_s10, %s143_s20  ;;  %p149_p5 = scmp.lt.s32.totalorder %s143_s20, %s143_s20 }
   0xd   :  { %p150_p6 = por %p149_p5, %p148_p4 }
   0xf   :  { %p151_p7 = pnand %p150_p6, %p144_p3 }
  0x11   :  { %154 = shalt.err (!%p151_p7)
}
  0x12   :  { %19 = dma.hbm_to_vmem [thread:$0]  %s266_s0, 128, %s17_s10, [#allocation3]  }
  0x13   :  { %s155_s25 = scalar_lea.hbm %s267_s1, 128 }
  0x14   :  { %p156_p8 = scmp.ne.s32.totalorder %s267_s1, %s155_s25  ;;  %p159_p9 = scmp.lt.u32.totalorder %s155_s25, %s267_s1 }
  0x16   :  { %p161_p10 = pnand %p159_p9, %p156_p8 }
  0x18   :  { %164 = shalt.err (!%p161_p10)
}
  0x19   :  { %s165_s30 = scalar_lea.vmem %s27_s12, 128  ;;  %p170_p12 = scmp.lt.s32.totalorder %s27_s12, %s27_s12 }
  0x1a   :  { %p166_p11 = scmp.ne.s32.totalorder %s27_s12, %s165_s30  ;;  %p171_p13 = scmp.lt.s32.totalorder %s165_s30, %s165_s30 }
  0x1c   :  { %p172_p0 = por %p171_p13, %p170_p12 }
  0x1e   :  { %p173_p1 = pnand %p172_p0, %p166_p11 }
  0x20   :  { %176 = shalt.err (!%p173_p1)
}
  0x21   :  { %29 = dma.hbm_to_vmem [thread:$0]  %s267_s1, 128, %s27_s12, [#allocation6]  }
  0x22   :  { %199 = dma.done.wait [#allocation3], 128  }
  0x23   :  { %200 = vsyncadd [#allocation3], 4294967168 }
  0x24   :  { %201 = dma.done.wait [#allocation6], 128  }
  0x25   :  { %202 = vsyncadd [#allocation6], 4294967168  ;;  %v207_v0 = vmov 0.0   ;;  %v41_v1 = vld [vmem:[#allocation2] sm:$0xff]  ;;  %v42_v7 = vld [vmem:[#allocation5] sm:$0xff]  ;;  %v85_v18 = vlaneseq  ;;  %s208_s1 = smov [#allocation7]  }
  0x26   :  { %40 = vst [vmem:[#allocation7] sm:$0x1] %v207_v0  ;;  %v43_v2 = vand.u32 2147483647, %v41_v1  ;;  %vm63_vm0 = vcmp.ge.f32.partialorder %v41_v1, 0.0  ;;  %v67_v10 = vsub.f32 1.0, %v42_v7  ;;  %v48_v24 = vmul.f32 %v42_v7, %v41_v1 }
  0x27   :  { %v86_v22 = vshrl.u32 %v85_v18, 7  ;;  %v47_v23 = vmax.f32 %v41_v1, 0.0  ;;  %v71_v28 = vmul.f32 0.25, %v42_v7  ;;  %v88_v32 = vand.u32 127, %v85_v18  ;;  %s111_s4 = sshll.u32 %s208_s1, 4  ;;  %s112_s4 = int_to_ptr.vmem [resolvable:$true] %s111_s4 }
  0x28   :  { %v44_v3 = vsub.f32 0.0, %v43_v2  ;;  %v72_v29 = vmul.f32 0.75, %v67_v10  ;;  %s177_s5 = scalar_lea.vmem %s112_s4, 16  ;;  %s181_s6 = scalar_lea.vmem %s112_s4, 32 }
  0x29   :  { %v92_v33 = vmul.u32 128, %v86_v22  ;;  %v49_v34 = vsub.f32 %v47_v23, %v48_v24  ;;  %p178_p2 = scmp.ne.s32.totalorder %s112_s4, %s177_s5  ;;  %p182_p3 = scmp.lt.s32.totalorder %s112_s4, %s112_s4 }
  0x2a   :  { %v45_v4 = vmul.f32 1.442695, %v44_v3  ;;  %v73_v37 = vadd.f32 %v72_v29, %v71_v28  ;;  %p183_p4 = scmp.lt.s32.totalorder %s181_s6, %s177_s5 }
  0x2b   :  { %v93_v40 = vadd.s32 %v92_v33, %v88_v32 }
  0x2c   :  { %125 = vpow2.f32 %v45_v4  ;;  %p184_p5 = por %p183_p4, %p182_p3 }
  0x2d   :  { %vm94_vm4 = vcmp.lt.s32.totalorder %v93_v40, 128  ;;  %v96_v51 = vld [vmem:[#allocation7] sm:$0x1] }
  0x2e   :  { %p185_p6 = pnand %p184_p5, %p178_p2 }
  0x36   :  { %v126_v5 = vpop.eup %125 }
  0x37   :  { %v50_v6 = vadd.f32 1.0, %v126_v5  ;;  %v53_v17 = vmul.f32 -0.5, %v126_v5  ;;  %v56_v21 = vand.u32 2147483647, %v126_v5 }
  0x39   :  { %127 = vrcp.f32 %v50_v6  ;;  %v54_v19 = vadd.f32 1.0, %v53_v17  ;;  %vm248_vm1 = vcmp.lt.f32.partialorder %v56_v21, 0.0004427343 }
  0x3a   :  { %129 = vlog2.f32 %v50_v6 }
  0x3b   :  { %v55_v26 = vmul.f32 %v126_v5, %v54_v19 }
  0x43   :  { %v128_v8 = vpop.eup %127 }
  0x44   :  { %v64_v9 = vmul.f32 %v128_v8, %v126_v5  ;;  %v130_v20 = vpop.eup %129 }
  0x45   :  { %v52_v25 = vmul.f32 0.6931472, %v130_v20 }
  0x46   :  { %v65_v11 = vsel %vm63_vm0, %v128_v8, %v64_v9 }
  0x47   :  { %v66_v12 = vmul.f32 %v65_v11, %v42_v7  ;;  %v68_v13 = vsub.f32 1.0, %v65_v11  ;;  %v58_v36 = vsel %vm248_vm1, %v55_v26, %v52_v25 }
  0x48   :  { %v59_v41 = vadd.f32 %v58_v36, %v49_v34 }
  0x49   :  { %v69_v14 = vmul.f32 %v68_v13, %v67_v10 }
  0x4b   :  { %v70_v15 = vadd.f32 %v69_v14, %v66_v12 }
  0x4d   :  { %v74_v16 = vsub.f32 1.0, %v70_v15 }
  0x4f   :  { %131 = vrsqrt.f32 %v74_v16  ;;  %vm77_vm2 = vcmp.eq.f32.partialorder %v74_v16, inf  ;;  %v80_v31 = vand.u32 2147483648, %v74_v16  ;;  %vm79_vm3 = vcmp.eq.f32.partialorder %v74_v16, 0.0 }
  0x59   :  { %v132_v30 = vpop.eup %131 }
  0x5a   :  { %v76_v35 = vmul.f32 %v132_v30, %v74_v16 }
  0x5c   :  { %v78_v38 = vsel %vm77_vm2, %v74_v16, %v76_v35 }
  0x5d   :  { %v81_v39 = vsel %vm79_vm3, %v80_v31, %v78_v38 }
  0x5e   :  { %v82_v42 = vmul.f32 %v81_v39, %v74_v16 }
  0x60   :  { %v83_v43 = vmul.f32 %v82_v42, %v73_v37 }
  0x62   :  { %v84_v44 = vmul.f32 %v83_v43, %v59_v41 }
  0x64   :  { %v95_v45 = vsel %vm94_vm4, %v84_v44, 0.0 }
  0x65   :  { %v97_v46 = vrot.slane %v95_v45, 4 }
  0x67   :  { %v98_v47 = vadd.f32 %v97_v46, %v95_v45 }
  0x69   :  { %v99_v48 = vrot.slane %v98_v47, 2 }
  0x6b   :  { %v100_v49 = vadd.f32 %v99_v48, %v98_v47 }
  0x6d   :  { %v101_v50 = vrot.slane %v100_v49, 1 }
  0x6f   :  { %v102_v52 = vadd.f32 %v101_v50, %v100_v49 }
  0x71   :  { %v103_v53 = vadd.f32 %v102_v52, %v96_v51 }
  0x73   :  { %104 = vst [vmem:[#allocation7] sm:$0x1] %v103_v53 }
  0x74   :  { %188 = shalt.err (!%p185_p6)
}
  0x75   :  { %s189_s9 = scalar_lea.hbm %s268_s2, 16 }
  0x76   :  { %p190_p7 = scmp.ne.s32.totalorder %s268_s2, %s189_s9  ;;  %p193_p8 = scmp.lt.u32.totalorder %s189_s9, %s268_s2 }
  0x78   :  { %p195_p9 = pnand %p193_p8, %p190_p7 }
  0x7a   :  { %198 = shalt.err (!%p195_p9)
}
  0x7b   :  { %114 = dma.vmem_to_hbm [thread:$0]  %s112_s4, 16, %s268_s2, [#allocation4]  }
  0x7c   :  { %203 = dma.done.wait [#allocation4], 16  }
  0x7d   :  { %204 = vsyncadd [#allocation4], 4294967280 }
  0x7e   :  { %118 = vsyncpa [#allocation3], 1 }
  0x7f   :  { %119 = vsyncpa [#allocation6], 1 }
  0x80   :  { %120 = vsyncpa [#allocation4], 1 }

</bundles_post_ra>
